<compile_context>
chip_gen: v7x
topology: tpu7x:2x2x1
jax: 0.10.0
libtpu: 0.0.40
codegen_flags: <defaults>
</compile_context>

<pallas_src>
import functools

import jax
import jax.numpy as jnp
from jax.experimental import pallas as pl
from jax.experimental.pallas import tpu as pltpu


def linear_kernel(x_ref, wb_ref, o_ref):
    # wb_ref: (K+1, N) — rows [0:K] are W.T, row K is the bias.
    k = x_ref.shape[1]
    w = wb_ref[:k, :]          # (K, N) static, sublane-aligned slice
    b = wb_ref[k:k + 1, :]     # (1, N) static, sublane-aligned slice
    # Single MXU matmul with f32 accumulation; bias broadcast-add over rows.
    acc = jnp.dot(x_ref[...], w, preferred_element_type=jnp.float32)
    o_ref[...] = (acc + b).astype(o_ref.dtype)


def prepare_params(weight, bias):
    """One-time (parameter-init-time) prep — NOT on the per-call hot path.

    weight: (N, K) PyTorch Linear layout; bias: (N,).
    Returns wb: (K+1, N) with wb[:K] = weight.T and wb[K] = bias, so the
    kernel needs only a single parameter DMA.
    """
    N, K = weight.shape
    wb = jnp.zeros((K + 1, N), weight.dtype)
    wb = wb.at[:K, :].set(weight.T)
    wb = wb.at[K, :].set(bias)
    return wb


@jax.jit
def net_forward(x, wb):
    """x: (B, K) float32; wb: (K+1, N) packed weight+bias."""
    B, K = x.shape
    N = wb.shape[1]

    return pl.pallas_call(
        linear_kernel,
        out_shape=jax.ShapeDtypeStruct((B, N), x.dtype),
        # Whole arrays in VMEM; no grid, no index_map bookkeeping.
        in_specs=[
            pl.BlockSpec(memory_space=pltpu.MemorySpace.VMEM),  # x       (B, K)
            pl.BlockSpec(memory_space=pltpu.MemorySpace.VMEM),  # wb  (K+1, N)
        ],
        out_specs=pl.BlockSpec(memory_space=pltpu.MemorySpace.VMEM),
        cost_estimate=pl.CostEstimate(
            flops=2 * B * K * N,
            transcendentals=0,
            bytes_accessed=4 * (B * K + (K + 1) * N + B * N),
        ),
    )(x, wb)


if __name__ == "__main__":
    # Small shapes consistent with the module: Net(input_size=32, num_classes=16)
    batch = 8
    input_size = 32
    num_classes = 16

    key = jax.random.PRNGKey(0)
    kx, kw, kb = jax.random.split(key, 3)

    # Deterministic parameter init (mimics PyTorch Linear's U(-1/sqrt(K), 1/sqrt(K)))
    bound = 1.0 / jnp.sqrt(jnp.float32(input_size))
    weight = jax.random.uniform(
        kw, (num_classes, input_size), jnp.float32, -bound, bound
    )
    bias = jax.random.uniform(kb, (num_classes,), jnp.float32, -bound, bound)

    x = jax.random.normal(kx, (batch, input_size), jnp.float32)

    # One-time parameter preparation (init-time, not per forward call).
    wb = prepare_params(weight, bias)

    out = net_forward(x, wb)
    out = jax.block_until_ready(out)

    # Correctness check against plain-JAX reference of the PyTorch semantics.
    ref = x @ weight.T + bias
    assert out.shape == (batch, num_classes)
    assert jnp.allclose(out, ref, atol=1e-5, rtol=1e-5)

    print("KERNEL_OK")
</pallas_src>

<mosaic_0001>
module attributes {stable_mosaic.version = 11 : i64} {
  func.func @linear_kernel(%arg0: memref<8x32xf32, #tpu.memory_space<vmem>>, %arg1: memref<33x16xf32, #tpu.memory_space<vmem>>, %arg2: memref<8x16xf32, #tpu.memory_space<vmem>>) attributes {dimension_semantics = [], scalar_prefetch = 0 : i64, scratch_operands = 0 : i64, tpu.core_type = #tpu.core_type<tc>} {
    %c0 = arith.constant 0 : index
    %c0_0 = arith.constant 0 : index
    %0 = vector.load %arg1[%c0, %c0_0] : memref<33x16xf32, #tpu.memory_space<vmem>>, vector<32x16xf32>
    %c32 = arith.constant 32 : index
    %c0_1 = arith.constant 0 : index
    %1 = vector.load %arg1[%c32, %c0_1] : memref<33x16xf32, #tpu.memory_space<vmem>>, vector<1x16xf32>
    %c0_2 = arith.constant 0 : index
    %c0_3 = arith.constant 0 : index
    %2 = vector.load %arg0[%c0_2, %c0_3] : memref<8x32xf32, #tpu.memory_space<vmem>>, vector<8x32xf32>
    %cst = arith.constant dense<0.000000e+00> : vector<8x16xf32>
    %3 = tpu.matmul %2, %0, %cst {dimension_numbers = #tpu.dot_dimension_numbers<[1], [0], [0], [1], [0, 0, 1, 1], [], []>} : vector<8x32xf32>, vector<32x16xf32>, vector<8x16xf32> -> vector<8x16xf32>
    %4 = vector.broadcast %1 : vector<1x16xf32> to vector<8x16xf32>
    %5 = arith.addf %3, %4 : vector<8x16xf32>
    %c0_4 = arith.constant 0 : index
    %c0_5 = arith.constant 0 : index
    %6 = vector.load %arg2[%c0_4, %c0_5] : memref<8x16xf32, #tpu.memory_space<vmem>>, vector<8x16xf32>
    tpu.vector_store %arg2[%c0_4, %c0_5], %5 {strides = array<i32>} : memref<8x16xf32, #tpu.memory_space<vmem>>, vector<8x16xf32>,
    return
  }
}

</mosaic_0001>

<bundles_post_ra>
// kernel: net_forward.1
= control target key start
LH: loop header
LB: loop body
LE: loop exit
PB: predicated region body
PF: predicated region fallthrough
CT: control target
= control target key end

     0   :  { %v164_v3 = vmov 0.0|0.0   ;;  %vm165_vm0 = vmmov 0   ;;  %v166_v6 = vmov 0.0   ;;  %s213_s0 = inlined_call_operand.vmem [shape: f32[8,32], index: 0, kind: input, shape index: {}]   ;;  %s214_s1 = inlined_call_operand.vmem [shape: f32[33,16], index: 1, kind: input, shape index: {}]   ;;  %s215_s2 = inlined_call_operand.hbm [shape: f32[8,16], index: 2, kind: output, shape index: {}]  }
   0x1   :  { %v12_v0 = vld [vmem:[%s214_s1] sm:$0xff]  ;;  %v13_v1 = vld [vmem:[%s214_s1 + $0x8] sm:$0xff]  ;;  %v14_v2 = vld [vmem:[%s214_s1 + $0x10] sm:$0xff]  ;;  %130 = vmatprep.subr.bf16.mxu0 %v164_v3  ;;  %127 = vmatprep.mubr.msk.f32.mxu0 %vm165_vm0, %v166_v6 }
   0x2   :  { %v131_v4 = vpack.c.bf16 %v13_v1, %v12_v0  ;;  %v15_v5 = vld [vmem:[%s214_s1 + $0x18] sm:$0xff] }
   0x3   :  { %7 = vsyncpa [#allocation3], 0  ;;  %v134_v7 = vpack.c.bf16 %v15_v5, %v14_v2  ;;  %v17_v8 = vld [vmem:[%s213_s0] sm:$0xff]  ;;  %vm22_vm1 = vcmask 261120   ;;  %s167_s21 = smov [#allocation2]   ;;  %vm96_vm2 = vcmask 130048  }
   0x4   :  { %132 = vmatpush3.bf16.msra.mxu0 %v131_v4  ;;  %v112_v9 = vld [vmem:[%s214_s1 + $0x20] ss:$0 sm:$0xff]  ;;  %s104_s22 = sshll.u32 %s167_s21, 4  ;;  %s105_s22 = int_to_ptr.vmem [resolvable:$true] %s104_s22 }
   0x5   :  { %133 = vmatprep.subr.bf16.mxu0 %v164_v3  ;;  %s140_s23 = scalar_lea.vmem %s105_s22, 128  ;;  %p145_p1 = scmp.lt.s32.totalorder %s105_s22, %s105_s22 }
   0x6   :  { %p141_p0 = scmp.ne.s32.totalorder %s105_s22, %s140_s23  ;;  %p146_p2 = scmp.lt.s32.totalorder %s140_s23, %s140_s23 }
   0x8   :  { %135 = vmatpush3.bf16.msra.mxu0 %v134_v7  ;;  %p147_p3 = por %p146_p2, %p145_p1 }
   0xa   :  { %p148_p4 = pnand %p147_p3, %p141_p0 }
   0xb   :  { %128 = vmatmul.mubr.msk.f32.vlgmr.msra.gmra.mrb[0].mxu0 %vm22_vm1, %v17_v8 }
  0xde   :  { %v92_v10 = vpop.f32.mrb[0].mxu0 }
  0xdf   :  { %v93_v11 = vadd.f32 %v112_v9, %v92_v10  ;;  %v129_v12 = vpop.f32.mrb[1].mxu0 }
  0xe1   :  { %97 = vst.msk [vmem:[#allocation2] sm:$0xff] %vm96_vm2, %v93_v11 }
  0xe2   :  { %151 = shalt.err (!%p148_p4)
}
  0xe3   :  { %s152_s25 = scalar_lea.hbm %s215_s2, 128 }
  0xe4   :  { %p153_p5 = scmp.ne.s32.totalorder %s215_s2, %s152_s25  ;;  %p156_p6 = scmp.lt.u32.totalorder %s152_s25, %s215_s2 }
  0xe6   :  { %p158_p7 = pnand %p156_p6, %p153_p5 }
  0xe8   :  { %161 = shalt.err (!%p158_p7)
}
  0xe9   :  { %107 = dma.vmem_to_hbm [thread:$0]  %s105_s22, 128, %s215_s2, [#allocation3]  }
  0xea   :  { %162 = dma.done.wait [#allocation3], 128  }
  0xeb   :  { %163 = vsyncadd [#allocation3], 4294967168 }
  0xec   :  { %111 = vsyncpa [#allocation3], 1 }

</bundles_post_ra>
